<compile_context>
chip_gen: v7x
topology: tpu7x:2x2x1
jax: 0.10.0
libtpu: 0.0.40
codegen_flags: <defaults>
</compile_context>

<pallas_src>
import functools

import jax
import jax.numpy as jnp
from jax.experimental import pallas as pl
from jax.experimental.pallas import tpu as pltpu


def _round_up(x, m):
    return (x + m - 1) // m * m


def _cdiv(a, b):
    return (a + b - 1) // b


# ----------------------------- Pallas kernels --------------------------------


def _linear_relu_kernel(x_ref, w_ref, b_ref, o_ref, *, bf16_operands):
    # x_ref: (tm, Kp), w_ref: (Kp, tn), b_ref: (1, tn), o_ref: (tm, tn)
    x = x_ref[...]
    w = w_ref[...]
    if bf16_operands:
        x = x.astype(jnp.bfloat16)
        w = w.astype(jnp.bfloat16)
    acc = jnp.dot(x, w, preferred_element_type=jnp.float32)
    o_ref[...] = jnp.maximum(acc + b_ref[...], 0.0).astype(o_ref.dtype)


def _linear_relu_ktiled_kernel(x_ref, w_ref, b_ref, o_ref, acc_ref, *, bf16_operands):
    # Grid: (M tiles, N tiles, K tiles); K is the last ("arbitrary") axis.
    k = pl.program_id(2)

    @pl.when(k == 0)
    def _():
        # Fold the bias add into accumulator init (saves one VPU pass per tile).
        acc_ref[...] = jnp.broadcast_to(b_ref[...], acc_ref.shape).astype(jnp.float32)

    x = x_ref[...]
    w = w_ref[...]
    if bf16_operands:
        x = x.astype(jnp.bfloat16)
        w = w.astype(jnp.bfloat16)
    acc_ref[...] += jnp.dot(x, w, preferred_element_type=jnp.float32)

    @pl.when(k == pl.num_programs(2) - 1)
    def _():
        o_ref[...] = jnp.maximum(acc_ref[...], 0.0).astype(o_ref.dtype)


# ------------------------------ tiling plan -----------------------------------

_K_SLAB_MAX = 2048  # above this, K is tiled along a reduction grid axis


def _k_plan(K):
    """Returns (tk, Kp). Single K slab (no padding) unless K is very large."""
    if K <= _K_SLAB_MAX:
        return K, K
    tk = _K_SLAB_MAX
    return tk, _round_up(K, tk)


def _vmem_budget_bytes():
    phys = 64 * 1024 * 1024  # conservative default (v7x per-TensorCore VMEM)
    try:
        info = pltpu.get_tpu_info()
        phys = int(getattr(info, "vmem_capacity_bytes", phys))
    except Exception:
        pass
    # Headroom for compiler scratch, semaphores, pipeline internals.
    return min((phys * 3) // 4, 100 * 1024 * 1024)


def _select_tiles(tk, Np, vmem_budget):
    # N tile: 256 keeps v6e/v7x 256x256 MXUs full; 128 on odd multiples of 128.
    tn = 256 if Np % 256 == 0 else 128
    tn = min(tn, Np)

    def working_set(tm):
        # double-buffered x/w/b/out tiles + f32 accumulator scratch (bytes)
        return 4 * (2 * tm * tk + 2 * tk * tn + 2 * tn + 2 * tm * tn + tm * tn)

    tm_cap = 1024 if vmem_budget >= 96 * 1024 * 1024 else 512
    tm = 8
    for cand in (1024, 512, 256, 128, 64, 32, 16, 8):
        if cand <= tm_cap and working_set(cand) <= vmem_budget:
            tm = cand
            break
    return tm, tn


# ------------------------------- wrappers -------------------------------------


def prepare_hidden_layer_params(weight, bias):
    """Convert PyTorch nn.Linear params to kernel layout (do this once per layer).

    weight: (N, K) PyTorch layout; bias: (N,).
    Returns (w_kn, b_row): (Kp, Np) weight in (K, N) layout and (1, Np) bias,
    zero-padded so Np is a multiple of 128 and Kp matches the K-tiling plan.
    """
    N, K = weight.shape
    _, Kp = _k_plan(K)
    Np = _round_up(N, 128)
    w = jnp.asarray(weight, jnp.float32).T  # (K, N)
    if Kp == K and Np == N:
        w_kn = w
        b_row = jnp.asarray(bias, jnp.float32).reshape(1, N)
    else:
        w_kn = jnp.zeros((Kp, Np), jnp.float32).at[:K, :N].set(w)
        b_row = jnp.zeros((1, Np), jnp.float32).at[0, :N].set(
            jnp.asarray(bias, jnp.float32))
    return w_kn, b_row


def hidden_layer_prepared(x, w_kn, b_row, n_out, *, use_bf16_operands=False):
    """relu(x @ W.T + b) with params already in kernel layout."""
    orig_shape = x.shape
    K = orig_shape[-1]
    x2 = jnp.asarray(x, jnp.float32).reshape(-1, K)
    M = x2.shape[0]

    tk, Kp = _k_plan(K)
    Kp_w, Np = w_kn.shape
    assert Kp_w == Kp and b_row.shape == (1, Np) and n_out <= Np

    vmem_budget = _vmem_budget_bytes()
    tm, tn = _select_tiles(tk, Np, vmem_budget)

    # Rows: only pad to the 8-sublane boundary when needed; never pad up to a
    # multiple of tm (cdiv grid handles the ragged last block via masked stores).
    Mp = M if M % 8 == 0 else _round_up(M, 8)
    tm = min(tm, Mp)

    if Mp != M or Kp != K:
        x_p = jnp.zeros((Mp, Kp), jnp.float32).at[:M, :K].set(x2)
    else:
        x_p = x2

    grid_m = _cdiv(Mp, tm)
    grid_n = Np // tn
    grid_k = Kp // tk

    cost = pl.CostEstimate(
        flops=2 * M * K * n_out,
        bytes_accessed=4 * (M * K + K * n_out + M * n_out),
        transcendentals=0,
    )

    if grid_k == 1:
        out = pl.pallas_call(
            functools.partial(_linear_relu_kernel, bf16_operands=use_bf16_operands),
            out_shape=jax.ShapeDtypeStruct((Mp, Np), jnp.float32),
            grid=(grid_m, grid_n),
            in_specs=[
                pl.BlockSpec((tm, Kp), lambda i, j: (i, 0)),
                pl.BlockSpec((Kp, tn), lambda i, j: (0, j)),
                pl.BlockSpec((1, tn), lambda i, j: (0, j)),
            ],
            out_specs=pl.BlockSpec((tm, tn), lambda i, j: (i, j)),
            compiler_params=pltpu.CompilerParams(
                dimension_semantics=("parallel", "parallel"),
                vmem_limit_bytes=int(vmem_budget),
            ),
            cost_estimate=cost,
        )(x_p, w_kn, b_row)
    else:
        out = pl.pallas_call(
            functools.partial(_linear_relu_ktiled_kernel,
                              bf16_operands=use_bf16_operands),
            out_shape=jax.ShapeDtypeStruct((Mp, Np), jnp.float32),
            grid=(grid_m, grid_n, grid_k),
            in_specs=[
                pl.BlockSpec((tm, tk), lambda i, j, k: (i, k)),
                pl.BlockSpec((tk, tn), lambda i, j, k: (k, j)),
                pl.BlockSpec((1, tn), lambda i, j, k: (0, j)),
            ],
            out_specs=pl.BlockSpec((tm, tn), lambda i, j, k: (i, j)),
            scratch_shapes=[pltpu.VMEM((tm, tn), jnp.float32)],
            compiler_params=pltpu.CompilerParams(
                dimension_semantics=("parallel", "parallel", "arbitrary"),
                vmem_limit_bytes=int(vmem_budget),
            ),
            cost_estimate=cost,
        )(x_p, w_kn, b_row)

    if Mp != M or Np != n_out:
        out = out[:M, :n_out]
    return out.reshape(*orig_shape[:-1], n_out)


def hidden_layer(x, weight, bias, *, use_bf16_operands=False):
    """Convenience wrapper taking PyTorch-layout weight (N, K) and bias (N,)."""
    w_kn, b_row = prepare_hidden_layer_params(weight, bias)
    return hidden_layer_prepared(x, w_kn, b_row, weight.shape[0],
                                 use_bf16_operands=use_bf16_operands)


# --------------------------------- main ---------------------------------------

if __name__ == "__main__":
    key = jax.random.PRNGKey(0)
    kx, kw, kb = jax.random.split(key, 3)

    batch, input_size, output_size = 2, 32, 16
    x = jax.random.normal(kx, (batch, input_size), jnp.float32)

    # PyTorch nn.Linear default init: U(-1/sqrt(fan_in), 1/sqrt(fan_in)).
    bound = 1.0 / (input_size ** 0.5)
    weight = jax.random.uniform(
        kw, (output_size, input_size), jnp.float32, -bound, bound)
    bias = jax.random.uniform(kb, (output_size,), jnp.float32, -bound, bound)

    # Hoist the transpose/pad of the call-invariant layer params out of the
    # per-call path (done once here, reused by every forward call).
    w_kn, b_row = prepare_hidden_layer_params(weight, bias)
    fwd = jax.jit(functools.partial(hidden_layer_prepared, n_out=output_size))

    out = fwd(x, w_kn, b_row)
    jax.block_until_ready(out)

    # Pure-JAX reference check of the fused kernel.
    ref = jnp.maximum(x @ weight.T + bias, 0.0)
    assert out.shape == (batch, output_size) and out.dtype == jnp.float32
    assert jnp.allclose(out, ref, rtol=1e-5, atol=1e-5)
    print("KERNEL_OK")
</pallas_src>

<mosaic_0001>
module attributes {stable_mosaic.version = 11 : i64} {
  func.func @_linear_relu_kernel(%arg0: i32, %arg1: i32, %arg2: memref<8x32xf32, #tpu.memory_space<vmem>>, %arg3: memref<32x128xf32, #tpu.memory_space<vmem>>, %arg4: memref<1x128xf32, #tpu.memory_space<vmem>>, %arg5: memref<8x128xf32, #tpu.memory_space<vmem>>) attributes {dimension_semantics = [#tpu.dimension_semantics<parallel>, #tpu.dimension_semantics<parallel>], iteration_bounds = array<i64: 1, 1>, scalar_prefetch = 0 : i64, scratch_operands = 0 : i64, tpu.core_type = #tpu.core_type<tc>, window_params = [{transform_indices = @transform_0, window_bounds = array<i64: 8, 32>}, {transform_indices = @transform_1, window_bounds = array<i64: 32, 128>}, {transform_indices = @transform_2, window_bounds = array<i64: 1, 128>}, {transform_indices = @transform_3, window_bounds = array<i64: 8, 128>}]} {
    %c0 = arith.constant 0 : index
    %c0_0 = arith.constant 0 : index
    %0 = vector.load %arg2[%c0, %c0_0] : memref<8x32xf32, #tpu.memory_space<vmem>>, vector<8x32xf32>
    %c0_1 = arith.constant 0 : index
    %c0_2 = arith.constant 0 : index
    %1 = vector.load %arg3[%c0_1, %c0_2] : memref<32x128xf32, #tpu.memory_space<vmem>>, vector<32x128xf32>
    %cst = arith.constant dense<0.000000e+00> : vector<8x128xf32>
    %2 = tpu.matmul %0, %1, %cst {dimension_numbers = #tpu.dot_dimension_numbers<[1], [0], [0], [1], [0, 0, 1, 1], [], []>} : vector<8x32xf32>, vector<32x128xf32>, vector<8x128xf32> -> vector<8x128xf32>
    %c0_3 = arith.constant 0 : index
    %c0_4 = arith.constant 0 : index
    %3 = vector.load %arg4[%c0_3, %c0_4] : memref<1x128xf32, #tpu.memory_space<vmem>>, vector<1x128xf32>
    %4 = vector.broadcast %3 : vector<1x128xf32> to vector<8x128xf32>
    %5 = arith.addf %2, %4 : vector<8x128xf32>
    %cst_5 = arith.constant 0.000000e+00 : f32
    %6 = vector.broadcast %cst_5 : f32 to vector<8x128xf32>
    %7 = arith.maximumf %5, %6 : vector<8x128xf32>
    %c0_6 = arith.constant 0 : index
    %c0_7 = arith.constant 0 : index
    %8 = vector.load %arg5[%c0_6, %c0_7] : memref<8x128xf32, #tpu.memory_space<vmem>>, vector<8x128xf32>
    tpu.vector_store %arg5[%c0_6, %c0_7], %7 {strides = array<i32>} : memref<8x128xf32, #tpu.memory_space<vmem>>, vector<8x128xf32>,
    return
  }
  func.func @transform_0(%arg0: i32, %arg1: i32) -> (i32, i32) {
    %c0_i32 = arith.constant 0 : i32
    %c0_i32_0 = arith.constant 0 : i32
    return %arg0, %c0_i32 : i32, i32
  }
  func.func @transform_1(%arg0: i32, %arg1: i32) -> (i32, i32) {
    %c0_i32 = arith.constant 0 : i32
    %c0_i32_0 = arith.constant 0 : i32
    return %c0_i32, %arg1 : i32, i32
  }
  func.func @transform_2(%arg0: i32, %arg1: i32) -> (i32, i32) {
    %c0_i32 = arith.constant 0 : i32
    %c0_i32_0 = arith.constant 0 : i32
    return %c0_i32, %arg1 : i32, i32
  }
  func.func @transform_3(%arg0: i32, %arg1: i32) -> (i32, i32) {
    %c0_i32 = arith.constant 0 : i32
    return %arg0, %arg1 : i32, i32
  }
}

</mosaic_0001>

<bundles_post_ra>
// kernel: hidden_layer_prepared.1
= control target key start
LH: loop header
LB: loop body
LE: loop exit
PB: predicated region body
PF: predicated region fallthrough
CT: control target
= control target key end

     0   :  { %8 = vsyncpa [#allocation3], 0  ;;  %s175_s12 = smov [#allocation2]   ;;  %s222_s0 = inlined_call_operand.vmem [shape: f32[8,32], index: 0, kind: input, shape index: {}]   ;;  %s223_s1 = inlined_call_operand.hbm [shape: f32[32,128], index: 1, kind: input, shape index: {}]   ;;  %s224_s2 = inlined_call_operand.vmem [shape: f32[1,128], index: 2, kind: input, shape index: {}]   ;;  %s225_s3 = inlined_call_operand.vmem [shape: f32[8,128], index: 3, kind: output, shape index: {}]  }
   0x1   :  { %s16_s13 = sshll.u32 %s175_s12, 4  ;;  %s151_s16 = scalar_lea.hbm %s223_s1, 512  ;;  %s17_s13 = int_to_ptr.vmem [resolvable:$true] %s16_s13 }
   0x2   :  { %p152_p0 = scmp.ne.s32.totalorder %s223_s1, %s151_s16  ;;  %p155_p1 = scmp.lt.u32.totalorder %s151_s16, %s223_s1 }
   0x4   :  { %p157_p2 = pnand %p155_p1, %p152_p0 }
   0x6   :  { %160 = shalt.err (!%p157_p2)
}
   0x7   :  { %s161_s21 = scalar_lea.vmem %s17_s13, 512  ;;  %p166_p4 = scmp.lt.s32.totalorder %s17_s13, %s17_s13 }
   0x8   :  { %p162_p3 = scmp.ne.s32.totalorder %s17_s13, %s161_s21  ;;  %p167_p5 = scmp.lt.s32.totalorder %s161_s21, %s161_s21 }
   0xa   :  { %p168_p6 = por %p167_p5, %p166_p4 }
   0xc   :  { %p169_p7 = pnand %p168_p6, %p162_p3 }
   0xe   :  { %172 = shalt.err (!%p169_p7)
}
   0xf   :  { %s176_s22 = smov 128   ;;  %s177_s23 = smov 8  }
  0x10   :  { %22 = dma.hbm_to_vmem [thread:$0]  %s223_s1, 512, %s17_s13, [#allocation3], %s176_s22, %s176_s22, %s177_s23  }
  0x11   :  { %173 = dma.done.wait [#allocation3], 512  }
  0x12   :  { %174 = vsyncadd [#allocation3], 4294966784  ;;  %v178_v0 = vmov 0.0|0.0   ;;  %vm179_vm0 = vmmov 0   ;;  %v180_v1 = vmov 0.0   ;;  %v29_v2 = vld [vmem:[#allocation2] sm:$0xff] }
  0x13   :  { %139 = vmatprep.subr.bf16.mxu0 %v178_v0  ;;  %136 = vmatprep.mubr.msk.f32.mxu0 %vm179_vm0, %v180_v1  ;;  %v30_v3 = vld [vmem:[#allocation2 + $0x8] sm:$0xff]  ;;  %v31_v4 = vld [vmem:[#allocation2 + $0x10] sm:$0xff]  ;;  %v32_v6 = vld [vmem:[#allocation2 + $0x18] sm:$0xff]  ;;  %vm40_vm1 = vcmask 261120  }
  0x14   :  { %v140_v5 = vpack.c.bf16 %v30_v3, %v29_v2  ;;  %v143_v7 = vpack.c.bf16 %v32_v6, %v31_v4  ;;  %v28_v8 = vld [vmem:[%s222_s0] sm:$0xff] }
  0x15   :  { %v121_v9 = vld [vmem:[%s224_s2] ss:$0 sm:$0xff] }
  0x16   :  { %141 = vmatpush3.bf16.msra.mxu0 %v140_v5 }
  0x17   :  { %142 = vmatprep.subr.bf16.mxu0 %v178_v0 }
  0x1a   :  { %144 = vmatpush3.bf16.msra.mxu0 %v143_v7 }
  0x1d   :  { %137 = vmatmul.mubr.msk.f32.vlgmr.msra.gmra.mrb[0].mxu0 %vm40_vm1, %v28_v8 }
  0xf0   :  { %v110_v10 = vpop.f32.mrb[0].mxu0 }
  0xf1   :  { %v111_v11 = vadd.f32 %v121_v9, %v110_v10  ;;  %v138_v12 = vpop.f32.mrb[1].mxu0 }
  0xf3   :  { %v114_v13 = vmax.f32 %v111_v11, 0.0 }
  0xf5   :  { %115 = vst [vmem:[%s225_s3] sm:$0xff] %v114_v13 }
  0xf6   :  { %120 = vsyncpa [#allocation3], 1 }

</bundles_post_ra>
